<compile_context>
chip_gen: v6e
topology: v6e:2x2x1
jax: 0.10.0
libtpu: 0.0.40
codegen_flags: <defaults>
</compile_context>

<pallas_src>
import functools
import math

import jax
import jax.numpy as jnp
from jax import lax
from jax.experimental import pallas as pl
from jax.experimental.pallas import tpu as pltpu


_LANE = 128
_SINGLE_K_MAX = 1024          # up to this K, use one un-padded reduction step
_MAX_TK = 512                 # multiple of 256 -> full 2x256 MXU on v6e/v7x


def _round_up(x: int, m: int) -> int:
    return ((x + m - 1) // m) * m


def _cdiv(a: int, b: int) -> int:
    return (a + b - 1) // b


def _sublane(dtype) -> int:
    return {4: 8, 2: 16, 1: 32}.get(jnp.dtype(dtype).itemsize, 8)


def _vmem_budget_bytes() -> int:
    cap = 64 * 1024 * 1024                 # conservative fallback (v7x per-TC)
    try:
        cap = int(pltpu.get_tpu_info().vmem_capacity_bytes)
    except Exception:
        pass
    # ~3/4 of physical VMEM, capped at 96 MiB on 128 MiB parts (v5e/v6e),
    # ~48 MiB on v7x's 64 MiB/TC -> double-buffering always fits.
    return max(32 * 1024 * 1024, min((cap * 3) // 4, 96 * 1024 * 1024))


def _k_tiling(K: int):
    """Returns (Kp, tk). Single un-padded step for K <= 1024, else 512-tiles."""
    if K <= _SINGLE_K_MAX:
        return K, K
    return _round_up(K, _MAX_TK), _MAX_TK


# ---------------------------------------------------------------------------
# Kernel
# ---------------------------------------------------------------------------
def _linear_kernel(*refs, has_bias: bool, mode: str, precision):
    """mode: 'single'  - one K step, write (part [+ bias]) directly;
             'acc_out' - f32 output, accumulate into the resident out block;
             'scratch' - f32 VMEM scratch accumulator, cast in the epilogue."""
    if has_bias:
        x_ref, w_ref, b_ref, o_ref, *scratch = refs
    else:
        x_ref, w_ref, o_ref, *scratch = refs
        b_ref = None

    part = lax.dot_general(
        x_ref[...], w_ref[...],
        dimension_numbers=(((1,), (0,)), ((), ())),       # (tm,tk) @ (tk,tn)
        preferred_element_type=jnp.float32,
        precision=precision,
    )

    if mode == "single":
        if has_bias:
            part = part + b_ref[...]
        o_ref[...] = part.astype(o_ref.dtype)
        return

    k = pl.program_id(2)
    nk = pl.num_programs(2)
    acc_ref = o_ref if mode == "acc_out" else scratch[0]

    @pl.when(k == 0)
    def _():
        acc_ref[...] = part

    @pl.when(k > 0)
    def _():
        acc_ref[...] += part

    if mode == "acc_out":
        if has_bias:
            @pl.when(k == nk - 1)
            def _():
                o_ref[...] += b_ref[...]
    else:
        @pl.when(k == nk - 1)
        def _():
            res = acc_ref[...]
            if has_bias:
                res = res + b_ref[...]
            o_ref[...] = res.astype(o_ref.dtype)


# ---------------------------------------------------------------------------
# Per-call wrapper (weight already prepared once at module init)
# ---------------------------------------------------------------------------
@functools.partial(
    jax.jit, static_argnames=("vmem_limit", "precision", "max_tm", "max_tn"))
def pallas_linear(x, w_kn, b_row=None, *, vmem_limit=48 * 1024 * 1024,
                  precision=None, max_tm=512, max_tn=512):
    """x: (..., K); w_kn: (Kp, N) pre-transposed / K-padded weight;
    b_row: (1, N) f32 bias row or None."""
    Kp, N = w_kn.shape
    lead = x.shape[:-1]
    K = x.shape[-1]
    M = int(math.prod(lead))
    out_dtype = x.dtype
    sub = _sublane(out_dtype)
    has_bias = b_row is not None

    x2d = x.reshape(M, K)
    if Kp != K:                         # zero-pad the contracted axis only
        x2d = jnp.pad(x2d, ((0, 0), (0, Kp - K)))

    tk = Kp if Kp <= _SINGLE_K_MAX else _MAX_TK
    grid_k = Kp // tk

    # M / N tiles: full dim when it fits, else 512 (multiple of 256 -> full
    # MXU width on v6e/v7x); ragged edges handled by Pallas masked stores.
    tm = _round_up(min(M, max_tm), sub)
    tn = N if N <= max_tn else max(256, (max_tn // 256) * 256)

    # Ensure >= 2 parallel blocks where possible (both v7x TensorCores busy).
    if _cdiv(M, tm) * _cdiv(N, tn) < 2:
        if M >= 2 * sub:
            tm = _round_up(_cdiv(M, 2), sub)
        elif N >= 2 * _LANE:
            tn = _round_up(_cdiv(N, 2), _LANE)

    xb = x2d.dtype.itemsize
    wb = w_kn.dtype.itemsize
    ob = out_dtype.itemsize

    def _footprint(tm_, tn_, tk_):
        f = 2 * (tm_ * tk_ * xb + tk_ * tn_ * wb + tm_ * tn_ * ob)
        f += tm_ * tn_ * 4                               # f32 accumulator
        if has_bias:
            f += 2 * tn_ * 4
        return f

    while _footprint(tm, tn, tk) > vmem_limit:
        if tn > 256:
            tn = _round_up(tn // 2, 256)
        elif tm > sub:
            tm = max(sub, _round_up(tm // 2, sub))
        else:
            break

    grid = (_cdiv(M, tm), _cdiv(N, tn), grid_k)

    if grid_k == 1:
        mode = "single"
    elif out_dtype == jnp.float32:
        mode = "acc_out"                # accumulate into resident out block
    else:
        mode = "scratch"

    in_specs = [
        pl.BlockSpec((tm, tk), lambda i, j, k: (i, k)),   # activations
        pl.BlockSpec((tk, tn), lambda i, j, k: (k, j)),   # weight (K, N)
    ]
    args = [x2d, w_kn]
    if has_bias:
        in_specs.append(pl.BlockSpec((1, tn), lambda i, j, k: (0, j)))
        args.append(b_row)

    scratch_shapes = []
    if mode == "scratch":
        scratch_shapes.append(pltpu.VMEM((tm, tn), jnp.float32))

    bytes_accessed = (grid[1] * M * Kp * xb       # x re-read once per N block
                      + grid[0] * Kp * N * wb     # W re-read once per M block
                      + M * N * ob)
    if has_bias:
        bytes_accessed += grid[0] * N * 4

    out2d = pl.pallas_call(
        functools.partial(_linear_kernel, has_bias=has_bias, mode=mode,
                          precision=precision),
        out_shape=jax.ShapeDtypeStruct((M, N), out_dtype),
        grid_spec=pltpu.PrefetchScalarGridSpec(
            num_scalar_prefetch=0,
            grid=grid,
            in_specs=in_specs,
            out_specs=pl.BlockSpec((tm, tn), lambda i, j, k: (i, j)),
            scratch_shapes=scratch_shapes,
        ),
        compiler_params=pltpu.CompilerParams(
            dimension_semantics=("parallel", "parallel", "arbitrary"),
            vmem_limit_bytes=int(vmem_limit),
        ),
        cost_estimate=pl.CostEstimate(
            flops=2 * M * N * Kp,
            transcendentals=0,
            bytes_accessed=int(bytes_accessed),
        ),
    )(*args)

    return out2d.reshape(*lead, N)


# ---------------------------------------------------------------------------
# Module-style wrapper (mirrors the torch `Linear` wrapper)
# ---------------------------------------------------------------------------
def xavier_uniform(key, out_channels, in_channels, dtype=jnp.float32):
    # torch.nn.init.xavier_uniform_: U(-a, a), a = sqrt(6 / (fan_in + fan_out))
    a = math.sqrt(6.0 / (in_channels + out_channels))
    return jax.random.uniform(key, (out_channels, in_channels), dtype=dtype,
                              minval=-a, maxval=a)


class PallasLinear:
    """Pallas TPU equivalent of the torch `Linear` wrapper module.

    Note: uses default MXU precision (bf16 passes) like XLA's default dot;
    pass precision=lax.Precision.HIGHEST for strict f32 parity.
    """

    def __init__(self, key, in_channels, out_channels, bias=True,
                 dtype=jnp.float32, precision=None):
        self.in_channels = in_channels
        self.out_channels = out_channels
        # torch-layout parameters: weight (out, in) xavier-uniform, bias zeros.
        self.weight = xavier_uniform(key, out_channels, in_channels, dtype)
        self.bias = jnp.zeros((out_channels,), dtype) if bias else None

        # One-time (hoisted) kernel-layout prep: W^T -> (K, N); pad the
        # contracted K dim once so the per-call path never copies W again.
        Kp, _ = _k_tiling(in_channels)
        w_kn = self.weight.T
        if Kp != in_channels:
            w_kn = jnp.pad(w_kn, ((0, Kp - in_channels), (0, 0)))
        self.w_kn = w_kn
        self.b_row = (self.bias.astype(jnp.float32).reshape(1, out_channels)
                      if bias else None)

        self.vmem_limit = _vmem_budget_bytes()
        self.precision = precision

    def __call__(self, x):
        return pallas_linear(x, self.w_kn, self.b_row,
                             vmem_limit=self.vmem_limit,
                             precision=self.precision)


if __name__ == "__main__":
    in_channels, out_channels = 32, 32
    batch, seq = 2, 8

    key = jax.random.PRNGKey(0)
    k_w, k_x, k_x2 = jax.random.split(key, 3)

    # Default module (bias=True), 3-D activations.
    lin = PallasLinear(k_w, in_channels, out_channels, bias=True)
    x = jax.random.normal(k_x, (batch, seq, in_channels), dtype=jnp.float32)
    out = jax.block_until_ready(lin(x))
    ref = x @ lin.weight.T + lin.bias
    assert out.shape == (batch, seq, out_channels)
    assert jnp.allclose(out, ref, atol=1e-5, rtol=1e-5)

    # bias=False path (no bias DMA / add) + ragged M (masked edge stores).
    lin_nb = PallasLinear(k_w, in_channels, out_channels, bias=False)
    x2 = jax.random.normal(k_x2, (13, in_channels), dtype=jnp.float32)
    out_nb = jax.block_until_ready(lin_nb(x2))
    ref_nb = x2 @ lin_nb.weight.T
    assert out_nb.shape == (13, out_channels)
    assert jnp.allclose(out_nb, ref_nb, atol=1e-5, rtol=1e-5)

    print("KERNEL_OK")
</pallas_src>

<mosaic_0001>
module attributes {stable_mosaic.version = 11 : i64} {
  func.func @_linear_kernel(%arg0: i32, %arg1: i32, %arg2: i32, %arg3: memref<8x32xf32, #tpu.memory_space<vmem>>, %arg4: memref<32x32xf32, #tpu.memory_space<vmem>>, %arg5: memref<1x32xf32, #tpu.memory_space<vmem>>, %arg6: memref<8x32xf32, #tpu.memory_space<vmem>>) attributes {dimension_semantics = [#tpu.dimension_semantics<parallel>, #tpu.dimension_semantics<parallel>, #tpu.dimension_semantics<arbitrary>], iteration_bounds = array<i64: 2, 1, 1>, scalar_prefetch = 0 : i64, scratch_operands = 0 : i64, tpu.core_type = #tpu.core_type<tc>, window_params = [{transform_indices = @transform_0, window_bounds = array<i64: 8, 32>}, {transform_indices = @transform_1, window_bounds = array<i64: 32, 32>}, {transform_indices = @transform_2, window_bounds = array<i64: 1, 32>}, {transform_indices = @transform_3, window_bounds = array<i64: 8, 32>}]} {
    %c0 = arith.constant 0 : index
    %c0_0 = arith.constant 0 : index
    %0 = vector.load %arg3[%c0, %c0_0] : memref<8x32xf32, #tpu.memory_space<vmem>>, vector<8x32xf32>
    %c0_1 = arith.constant 0 : index
    %c0_2 = arith.constant 0 : index
    %1 = vector.load %arg4[%c0_1, %c0_2] : memref<32x32xf32, #tpu.memory_space<vmem>>, vector<32x32xf32>
    %cst = arith.constant dense<0.000000e+00> : vector<8x32xf32>
    %2 = tpu.matmul %0, %1, %cst {dimension_numbers = #tpu.dot_dimension_numbers<[1], [0], [0], [1], [0, 0, 1, 1], [], []>} : vector<8x32xf32>, vector<32x32xf32>, vector<8x32xf32> -> vector<8x32xf32>
    %c0_3 = arith.constant 0 : index
    %c0_4 = arith.constant 0 : index
    %3 = vector.load %arg5[%c0_3, %c0_4] : memref<1x32xf32, #tpu.memory_space<vmem>>, vector<1x32xf32>
    %4 = vector.broadcast %3 : vector<1x32xf32> to vector<8x32xf32>
    %5 = arith.addf %2, %4 : vector<8x32xf32>
    %c0_5 = arith.constant 0 : index
    %c0_6 = arith.constant 0 : index
    %6 = vector.load %arg6[%c0_5, %c0_6] : memref<8x32xf32, #tpu.memory_space<vmem>>, vector<8x32xf32>
    tpu.vector_store %arg6[%c0_5, %c0_6], %5 {strides = array<i32>} : memref<8x32xf32, #tpu.memory_space<vmem>>, vector<8x32xf32>,
    return
  }
  func.func @transform_0(%arg0: i32, %arg1: i32, %arg2: i32) -> (i32, i32) {
    %c0_i32 = arith.constant 0 : i32
    return %arg0, %arg2 : i32, i32
  }
  func.func @transform_1(%arg0: i32, %arg1: i32, %arg2: i32) -> (i32, i32) {
    %c0_i32 = arith.constant 0 : i32
    return %arg2, %arg1 : i32, i32
  }
  func.func @transform_2(%arg0: i32, %arg1: i32, %arg2: i32) -> (i32, i32) {
    %c0_i32 = arith.constant 0 : i32
    %c0_i32_0 = arith.constant 0 : i32
    return %c0_i32, %arg1 : i32, i32
  }
  func.func @transform_3(%arg0: i32, %arg1: i32, %arg2: i32) -> (i32, i32) {
    %c0_i32 = arith.constant 0 : i32
    return %arg0, %arg1 : i32, i32
  }
}

</mosaic_0001>

<bundles_post_ra>
// kernel: pallas_linear.1
= control target key start
LH: loop header
LB: loop body
LE: loop exit
PB: predicated region body
PF: predicated region fallthrough
CT: control target
= control target key end

     0   :  { %8 = vsyncpa [#allocation3], 0  ;;  %s916_s0 = inlined_call_operand.hbm [shape: f32[16,32], index: 0, kind: input, shape index: {}]   ;;  %s917_s1 = inlined_call_operand.hbm [shape: f32[32,32], index: 1, kind: input, shape index: {}]   ;;  %s918_s2 = inlined_call_operand.vmem [shape: f32[1,32], index: 2, kind: input, shape index: {}]   ;;  %s919_s3 = inlined_call_operand.hbm [shape: f32[16,32], index: 3, kind: output, shape index: {}]  }
   0x1   :  { %10 = vsyncpa [#allocation3 + $0x1], 0 }
   0x2   :  { %11 = vsyncpa [#allocation6], 0 }
   0x3   :  { %12 = vsyncpa [#allocation4], 0 }
   0x4   :  { %14 = vsyncpa [#allocation4 + $0x1], 0  ;;  %s740_s12 = smov 0   ;;  %s742_s13 = smov 0  }
   0x5   :  { %s744_s14 = smov 0   ;;  %s746_s15 = smov 0  }
   0x6   :  { %s748_s16 = smov 0   ;;  %s750_s17 = smov 0  }
   0x7 LB: > { %s462_s18 = sadd.s32 4294967295, %s711_s17   ;;  %s463_s19 = sadd.s32 4294967294, %s711_s17   ;;  %s711_s17 = sphi %s750_s17, %s20_s17   ;;  %s707_s16 = sphi %s748_s16, %s937_s16   ;;  %s703_s15 = sphi %s746_s15, %s936_s15   ;;  %s699_s14 = sphi %s744_s14, %s935_s14   ;;  %s695_s13 = sphi %s742_s13, %s934_s13   ;;  %s691_s12 = sphi %s740_s12, %s933_s12  }
   0x8   : > { %p61_p0 = scmp.ne.s32.totalorder %s695_s13, %s691_s12  ;;  %p774_p1 = scmp.eq.s32.totalorder %s462_s18, 0 }
   0x9   : > { %p778_p2 = scmp.eq.s32.totalorder %s462_s18, 1  ;;  %p147_p3 = scmp.eq.s32.totalorder %s463_s19, 1 }
   0xa   : > { %p784_p4 = por %p774_p1, %p61_p0  ;;  %p464_p5 = scmp.ge.s32.totalorder %s711_s17, 1 }
   0xb   : > { %p789_p6 = por %p147_p3, %p61_p0  ;;  %p154_p7 = scmp.lt.s32.totalorder %s711_s17, 3 }
   0xc   : > { %s923_s22 = scalar_select %p784_p4, 1, 0 }
   0xd   : > { %s924_s23 = scalar_select %p789_p6, 1, 0 }
   0xe   : > { %p794_p8 = pnand %p464_p5, %p154_p7  ;;  %s713_s25 = smov [#allocation5]  }
   0xf   : > { %s170_s26 = sshll.u32 %s713_s25, 4  ;;  %s39_s28 = sadd.s32 1, %s707_s16  ;;  %s171_s26 = int_to_ptr.vmem [resolvable:$true] %s170_s26 }
  0x10   : > { %p504_p9 = pneg %p794_p8  ;;  %s584_s29 = scalar_lea.vmem %s171_s26, 512 }
  0x11   : > { %p585_p13 = scmp.ne.s32.totalorder %s171_s26, %s584_s29  ;;  %p592_p5 = scmp.lt.s32.totalorder %s171_s26, %s171_s26 }
  0x12   : > { %p803_p11 = pnand %p504_p9, %p774_p1  ;;  %p593_p7 = scmp.lt.s32.totalorder %s584_s29, %s584_s29 }
  0x14   : > { %p575_p12 = pneg %p803_p11  ;;  %p594_p6 = por %p593_p7, %p592_p5 }
  0x16   : > { %p587_p0 = pnand %p585_p13, %p575_p12 }
  0x18   : > { %p588_p3 = pneg %p587_p0 }
  0x1a   : > { %p595_p4 = pnand %p594_p6, %p588_p3 }
  0x1c   : > { %598 = shalt.err (!%p595_p4)
}
  0x1d   : > { %s714_s30 = smov 128   ;;  %s715_s4 = smov 8  }
  0x1e   : > { %507 = dma.hbm_to_vmem [thread:$0]  (!%p803_p11), %s917_s1, 512, %s171_s26, [#allocation6], %s714_s30, %s714_s30, %s715_s4  }
  0x1f   : > { %p41_p6 = scmp.ge.s32.totalorder %s39_s28, 2  ;;  %s48_s7 = sadd.s32 1, %s699_s14 }
  0x20   : > { %p55_p4 = scmp.ne.s32.totalorder %s699_s14, %s695_s13  ;;  %p56_p9 = scmp.eq.s32.totalorder %s711_s17, 0 }
  0x21   : > { %s939_s28 = smov (%p41_p6, %s39_s28), 0  ;;  %p517_p0 = scmp.lt.s32.totalorder %s711_s17, 2 }
  0x22   : > { %p821_p12 = por %p56_p9, %p55_p4  ;;  %p827_p13 = por %p778_p2, %p55_p4 }
  0x23   : > { %s43_s10 = ssub.s32 %s707_s16, %s939_s28  ;;  %s190_s11 = sand.u32 1, %s699_s14  }
  0x24   : > { %p46_p11 = scmp.eq.s32.totalorder %s43_s10, 0  ;;  %s468_s18 = sshll.u32 %s190_s11, 3 }
  0x25   : > { %s469_s25 = sshll.u32 %s707_s16, 7  ;;  %s194_s30 = scalar_lea.vmem [#allocation2], %s468_s18 }
  0x26   : > { %s836_s19 = scalar_select %p46_p11, %s699_s14, %s48_s7  }
  0x27   : > { %s200_s29 = scalar_lea.hbm %s916_s0, %s469_s25  ;;  %s202_s4 = sshll.u32 %s194_s30, 4  ;;  %s203_s4 = int_to_ptr.vmem [resolvable:$true] %s202_s4 }
  0x28   : > { %p844_p2 = pnand %p517_p0, %p821_p12  ;;  %s191_s5 = scalar_lea.sflag [#allocation3], %s190_s11 }
  0x29   : > { %s612_s6 = scalar_lea.vmem %s203_s4, 128  ;;  %s716_s7 = smov [#allocation2]  }
  0x2a   : > { %p601_p3 = pneg %p844_p2  ;;  %p613_p5 = scmp.ne.s32.totalorder %s203_s4, %s612_s6 }
  0x2b   : > { %s617_s10 = sshll.u32 %s716_s7, 4  ;;  %s618_s10 = int_to_ptr.vmem [resolvable:$false] %s617_s10 }
  0x2c   : > { %p615_p7 = pnand %p613_p5, %p601_p3  ;;  %s619_s25 = scalar_lea.vmem %s618_s10, 256 }
  0x2d   : > { %p620_p4 = scmp.lt.s32.totalorder %s203_s4, %s618_s10  ;;  %p621_p9 = scmp.lt.s32.totalorder %s619_s25, %s612_s6 }
  0x2e   : > { %p616_p6 = pneg %p615_p7 }
  0x2f   : > { %p622_p11 = por %p621_p9, %p620_p4 }
  0x31   : > { %p623_p10 = pnand %p622_p11, %p616_p6 }
  0x33   : > { %626 = shalt.err (!%p623_p10)
}
  0x34   : > { %511 = dma.hbm_to_vmem [thread:$0]  (!%p844_p2), %s200_s29, 128, %s203_s4, %s191_s5  }
  0x35   : > { %211 = sbr.rel (%p794_p8) target bundleno = 278 (0x116), region = 32  ;;  %s855_s8 = sand.u32 (!%p794_p8), 1, %s695_s13  }
  0x36   : > { %s471_s11 = sshll.u32 (!%p794_p8), %s855_s8, 3  ;;  %s214_s18 = scalar_lea.sflag (!%p794_p8), [#allocation3], %s855_s8 }
  0x37   : > { %s217_s26 = scalar_lea.vmem (!%p794_p8), [#allocation2], %s471_s11  ;;  %p930_p12 = scmp.ne.s32.totalorder (!%p794_p8), %s923_s22, 0 }
  0x3a   : > { %678 = dma.done.wait (%p930_p12), %s214_s18, 128  }
  0x3b   : > { %680 = vsyncadd (%p930_p12), %s214_s18, 4294967168 }
  0x3c   : > { %682 = dma.done.wait (%p774_p1), [#allocation6], 512  }
  0x3d   : > { %684 = vsyncadd (%p774_p1), [#allocation6], 4294966784  ;;  %v717_v0 = vmov 0.0   ;;  %vm718_vm0 = vmmov 0   ;;  %v255_v1 = vld [vmem:[#allocation5 + $0x18] sm:$0xff]  ;;  %v254_v2 = vld [vmem:[#allocation5 + $0x10] sm:$0xff] }
  0x3e   : > { %485 = vmatprep.subr.mxu0 %v717_v0  ;;  %493 = vmatprep.mubr.msk.f32.mxu0 %vm718_vm0, %v717_v0  ;;  %v253_v3 = vld [vmem:[#allocation5 + $0x8] sm:$0xff]  ;;  %v252_v4 = vld [vmem:[#allocation5] sm:$0xff]  ;;  %v251_v5 = vld [vmem:[%s217_s26] sm:$0xff]  ;;  %vm263_vm1 = vcmask 261120   ;;  %s477_s24 = sshll.u32 %s703_s15, 7  ;;  %s246_s27 = scalar_lea.vmem [#allocation7], %s471_s11 }
  0x3f   : > { %486 = vmatpush3.msra.mxu0 %v255_v1  ;;  %v474_v6 = vld [vmem:[%s918_s2] ss:$0 sm:$0xff]  ;;  %s353_s29 = sshll.u32 %s246_s27, 4  ;;  %s874_s21 = scalar_lea.hbm %s919_s3, %s477_s24  ;;  %s354_s29 = int_to_ptr.vmem [resolvable:$true] %s353_s29 }
  0x40   : > { %487 = vmatprep.subr.mxu0 %v717_v0  ;;  %s339_s5 = scalar_lea.sflag [#allocation4], %s855_s8  ;;  %s627_s6 = scalar_lea.vmem %s354_s29, 128 }
  0x41   : > { %488 = vmatpush3.msra.mxu0 %v254_v2  ;;  %p628_p1 = scmp.ne.s32.totalorder %s354_s29, %s627_s6  ;;  %s719_s7 = smov [#allocation7]  }
  0x42   : > { %489 = vmatprep.subr.mxu0 %v717_v0  ;;  %s631_s15 = sshll.u32 %s719_s7, 4  ;;  %s632_s15 = int_to_ptr.vmem [resolvable:$false] %s631_s15 }
  0x43   : > { %490 = vmatpush3.msra.mxu0 %v253_v3  ;;  %p629_p8 = pnand %p628_p1, %p827_p13  ;;  %s633_s10 = scalar_lea.vmem %s632_s15, 256 }
  0x44   : > { %491 = vmatprep.subr.mxu0 %v717_v0  ;;  %p634_p0 = scmp.lt.s32.totalorder %s354_s29, %s632_s15  ;;  %p635_p2 = scmp.lt.s32.totalorder %s633_s10, %s627_s6 }
  0x45   : > { %492 = vmatpush3.msra.mxu0 %v252_v4  ;;  %p630_p10 = pneg %p629_p8 }
  0x46   : > { %494 = vmatmul.mubr.msk.f32.vlgmr.msra.gmra.mxu0 %vm263_vm1, %v251_v5  ;;  %p636_p3 = por %p635_p2, %p634_p0 }
  0x48   : > { %p637_p5 = pnand %p636_p3, %p630_p10 }
 0x106   : > { %v333_v7 = vpop.f32.mrf.mxu0 }
 0x107   : > { %v334_v8 = vadd.f32 %v474_v6, %v333_v7 }
 0x108   : > { %v495_v9 = vpop.f32.mrf.mxu0 }
 0x109   : > { %337 = vst.msk [vmem:[%s246_s27] sm:$0xff] %vm263_vm1, %v334_v8 }
 0x10a   : > { %640 = shalt.err (!%p637_p5)
}
 0x10b   : > { %s641_s25 = scalar_lea.hbm %s874_s21, 128  ;;  %s645_s18 = scalar_lea.hbm %s919_s3, 256 }
 0x10c   : > { %p642_p7 = scmp.ne.s32.totalorder %s874_s21, %s641_s25  ;;  %p646_p9 = scmp.lt.s32.totalorder %s874_s21, %s919_s3 }
 0x10d   : > { %p647_p11 = scmp.lt.s32.totalorder %s645_s18, %s641_s25 }
 0x10e   : > { %p643_p6 = pnand %p642_p7, %p827_p13 }
 0x10f   : > { %p648_p12 = por %p647_p11, %p646_p9 }
 0x110   : > { %p644_p4 = pneg %p643_p6 }
 0x112   : > { %p649_p1 = pnand %p648_p12, %p644_p4 }
 0x114   : > { %652 = shalt.err (!%p649_p1)
}
 0x115   : > { %502 = dma.vmem_to_hbm [thread:$0]  (%p827_p13), %s354_s29, 128, %s874_s21, %s339_s5  }
 0x116 PF: > { %s365_s22 = sand.u32 1, %s691_s12   ;;  %p931_p8 = scmp.ne.s32.totalorder %s924_s23, 0 }
 0x117   : > { %p932_p10 = scmp.ge.s32.totalorder %s711_s17, 2  ;;  %s366_s24 = scalar_lea.sflag [#allocation4], %s365_s22 }
 0x119   : > { %p513_p0 = pnand %p932_p10, %p931_p8 }
 0x11b   : > { %p514_p2 = pneg %p513_p0 }
 0x11d   : > { %686 = dma.done.wait (%p514_p2), %s366_s24, 128  }
 0x11e   : > { %688 = vsyncadd (%p514_p2), %s366_s24, 4294967168  ;;  %s20_s17 = sadd.s32 1, %s711_s17   ;;  %s933_s12 = smov %s695_s13 }
 0x11f   : > { %p17_p3 = scmp.ge.s32.totalorder %s20_s17, 4   ;;  %s934_s13 = smov %s699_s14 }
 0x120   : > { %s935_s14 = smov %s836_s19  ;;  %s936_s15 = smov %s707_s16 }
 0x121   : > { %s937_s16 = smov %s939_s28  ;;  %19 = sbr.rel (!%p17_p3) target bundleno = 7 (0x7), region = 85 }
 0x126   :  { %371 = vsyncpa [#allocation3], 1 }
 0x127   :  { %373 = vsyncpa [#allocation3 + $0x1], 1 }
 0x128   :  { %374 = vsyncpa [#allocation6], 1 }
 0x129   :  { %375 = vsyncpa [#allocation4], 1 }
 0x12a   :  { %377 = vsyncpa [#allocation4 + $0x1], 1 }

</bundles_post_ra>
